<compile_context>
chip_gen: v7x
topology: tpu7x:2x2x1
jax: 0.10.0
libtpu: 0.0.40
codegen_flags: <defaults>
</compile_context>

<pallas_src>
import math

import jax
import jax.numpy as jnp
import numpy as np
from jax.experimental import pallas as pl
from jax.experimental.pallas import tpu as pltpu


def _attention_kernel(q_ref, k_ref, v_ref, wp_ref, bp_ref, o_ref, y_ref):
    """One (batch, query-tile) grid step, all heads at once.

    q_ref : (1, H, tq, hd) bf16  query tile (softmax scale already folded in)
    k_ref : (1, H, N,  hd) bf16  full-sequence keys for this batch
    v_ref : (1, H, N,  hd) bf16  full-sequence values for this batch
    wp_ref: (C, C) bf16          output projection (VMEM resident)
    bp_ref: (1, C) f32           output projection bias
    o_ref : (1, tq, C)           output tile
    y_ref : (tq, C) bf16 scratch head outputs packed channel-major
    """
    q = q_ref[0]                         # (H, tq, hd)
    k = k_ref[0]                         # (H, N,  hd)
    v = v_ref[0]                         # (H, N,  hd)
    H, _, hd = q.shape

    # Scores for all heads: bf16 MXU inputs, f32 accumulation.
    s = jnp.einsum("hqd,hkd->hqk", q, k,
                   preferred_element_type=jnp.float32)          # (H, tq, N)

    # Numerically stable softmax in f32 (EUP exp, approx reciprocal).
    # TODO(synk): bf16 exp on v6e/v7x would halve EUP time if it ever binds.
    s = s - jnp.max(s, axis=-1, keepdims=True)
    p = jnp.exp(s)
    p = p * pl.reciprocal(jnp.sum(p, axis=-1, keepdims=True), approx=True)
    # TODO(synk): attention_dropout omitted (rate 0.0 -> identity)

    y = jnp.einsum("hqk,hkd->hqd", p.astype(jnp.bfloat16), v,
                   preferred_element_type=jnp.float32)          # (H, tq, hd)

    # Pack heads into (tq, C) at static column offsets (cheap masked stores),
    # then one MXU-filling K=C projection matmul.
    for h in range(H):
        y_ref[:, h * hd:(h + 1) * hd] = y[h].astype(y_ref.dtype)

    out = jnp.dot(y_ref[...], wp_ref[...],
                  preferred_element_type=jnp.float32) + bp_ref[...]
    # TODO(synk): projection_dropout omitted (rate 0.0 -> identity)
    o_ref[0] = out.astype(o_ref.dtype)


def _pick_tq(N, H):
    """Generation-aware query-tile size, capped so (H,tq,N) f32 scores fit."""
    try:
        kind = jax.devices()[0].device_kind.lower()
        prefer = 128 if "v5" in kind else 256        # v5e: 128x128 MXU, 1 vst slot
    except Exception:  # pragma: no cover - defensive
        prefer = 256
    budget = 16 * 1024 * 1024                        # s + p intermediates
    while prefer > 128 and H * prefer * N * 8 > budget:
        prefer //= 2
    for t in (prefer, 128):
        if N % t == 0 and N >= t:
            return t
    return N                                          # untiled (e.g. ViT N=197)


def self_attention(x, w_qkv, b_qkv, w_proj, b_proj, head_count):
    """x: (B, N, C) float32. w_qkv: (C, 3C), b_qkv: (3C,), w_proj: (C, C),
    b_proj: (C,). Weights are W[in, out] (PyTorch weight transposed)."""
    B, N, C = x.shape
    H = head_count
    assert C % H == 0
    hd = C // H
    scale = 1.0 / math.sqrt(hd)
    cdt = jnp.bfloat16

    # Single MXU-ideal QKV projection, computed once (not per query tile).
    qkv = jnp.dot(x.astype(cdt).reshape(B * N, C), w_qkv.astype(cdt),
                  preferred_element_type=jnp.float32) + b_qkv.astype(jnp.float32)
    qkv = qkv.reshape(B, N, 3, H, hd).transpose(2, 0, 3, 1, 4)   # (3, B, H, N, hd)
    q = (qkv[0] * scale).astype(cdt)    # scale folded into q (scalar mult, exact)
    k = qkv[1].astype(cdt)
    v = qkv[2].astype(cdt)

    tq = _pick_tq(N, H)
    nqt = N // tq

    wp = w_proj.astype(cdt)                          # (C, C) resident in VMEM
    bp = b_proj.reshape(1, C).astype(jnp.float32)    # (1, C)

    grid = (B, nqt)

    # NOTE: k/v block indices only change with the batch axis, so Pallas does
    # not re-DMA them across query tiles; w_proj/b_proj are fully resident.
    return pl.pallas_call(
        _attention_kernel,
        out_shape=jax.ShapeDtypeStruct((B, N, C), x.dtype),
        grid_spec=pltpu.PrefetchScalarGridSpec(
            num_scalar_prefetch=0,
            grid=grid,
            in_specs=[
                pl.BlockSpec((1, H, tq, hd), lambda b, qi: (b, 0, qi, 0)),  # q tile
                pl.BlockSpec((1, H, N, hd), lambda b, qi: (b, 0, 0, 0)),    # k
                pl.BlockSpec((1, H, N, hd), lambda b, qi: (b, 0, 0, 0)),    # v
                pl.BlockSpec((C, C), lambda b, qi: (0, 0)),                 # w_proj
                pl.BlockSpec((1, C), lambda b, qi: (0, 0)),                 # b_proj
            ],
            out_specs=pl.BlockSpec((1, tq, C), lambda b, qi: (b, qi, 0)),
            scratch_shapes=[pltpu.VMEM((tq, C), cdt)],
        ),
        compiler_params=pltpu.CompilerParams(
            dimension_semantics=("parallel", "parallel"),
            vmem_limit_bytes=64 * 1024 * 1024),
    )(q, k, v, wp, bp)


def _reference(x, w_qkv, b_qkv, w_proj, b_proj, head_count):
    """Pure-JAX f32 reference matching the PyTorch forward."""
    B, N, C = x.shape
    hd = C // head_count
    scale = 1.0 / math.sqrt(hd)
    qkv = x @ w_qkv + b_qkv                                    # (B, N, 3C)
    qkv = qkv.reshape(B, N, 3, head_count, hd).transpose(2, 0, 3, 1, 4)
    q, k, v = qkv[0], qkv[1], qkv[2]                           # (B, H, N, hd)
    attn = jnp.einsum("bhqd,bhkd->bhqk", q, k) * scale
    attn = jax.nn.softmax(attn, axis=-1)
    y = jnp.einsum("bhqk,bhkd->bhqd", attn, v)                 # (B, H, N, hd)
    y = y.transpose(0, 2, 1, 3).reshape(B, N, C)
    return y @ w_proj + b_proj


if __name__ == "__main__":
    B, N, C = 2, 8, 32
    head_count = 4

    key = jax.random.PRNGKey(0)
    kx, kw1, kb1, kw2, kb2 = jax.random.split(key, 5)

    # Deterministic PyTorch-style Linear init: U(-1/sqrt(fan_in), 1/sqrt(fan_in))
    bound = 1.0 / math.sqrt(C)
    x = jax.random.normal(kx, (B, N, C), dtype=jnp.float32)
    w_qkv = jax.random.uniform(kw1, (C, 3 * C), jnp.float32, -bound, bound)
    b_qkv = jax.random.uniform(kb1, (3 * C,), jnp.float32, -bound, bound)
    w_proj = jax.random.uniform(kw2, (C, C), jnp.float32, -bound, bound)
    b_proj = jax.random.uniform(kb2, (C,), jnp.float32, -bound, bound)

    out = self_attention(x, w_qkv, b_qkv, w_proj, b_proj, head_count)
    out = jax.block_until_ready(out)

    ref = _reference(x, w_qkv, b_qkv, w_proj, b_proj, head_count)
    # Tolerance loosened vs. the f32 reference because MXU inputs are bf16.
    np.testing.assert_allclose(np.asarray(out), np.asarray(ref),
                               rtol=5e-2, atol=5e-2)
    print("KERNEL_OK")
</pallas_src>

<mosaic_0001>
module attributes {stable_mosaic.version = 11 : i64} {
  func.func @_attention_kernel(%arg0: i32, %arg1: i32, %arg2: memref<1x4x8x8xbf16, #tpu.memory_space<vmem>>, %arg3: memref<1x4x8x8xbf16, #tpu.memory_space<vmem>>, %arg4: memref<1x4x8x8xbf16, #tpu.memory_space<vmem>>, %arg5: memref<32x32xbf16, #tpu.memory_space<vmem>>, %arg6: memref<1x32xf32, #tpu.memory_space<vmem>>, %arg7: memref<1x8x32xf32, #tpu.memory_space<vmem>>, %arg8: memref<8x32xbf16, #tpu.memory_space<vmem>>) attributes {dimension_semantics = [#tpu.dimension_semantics<parallel>, #tpu.dimension_semantics<parallel>], iteration_bounds = array<i64: 2, 1>, scalar_prefetch = 0 : i64, scratch_operands = 1 : i64, tpu.core_type = #tpu.core_type<tc>, window_params = [{transform_indices = @transform_0, window_bounds = array<i64: 1, 4, 8, 8>}, {transform_indices = @transform_1, window_bounds = array<i64: 1, 4, 8, 8>}, {transform_indices = @transform_2, window_bounds = array<i64: 1, 4, 8, 8>}, {pipeline_mode = #tpu.pipeline_mode<synchronous>, transform_indices = @transform_3, window_bounds = array<i64: 32, 32>}, {pipeline_mode = #tpu.pipeline_mode<synchronous>, transform_indices = @transform_4, window_bounds = array<i64: 1, 32>}, {transform_indices = @transform_5, window_bounds = array<i64: 1, 8, 32>}]} {
    %c0 = arith.constant 0 : index
    %c0_0 = arith.constant 0 : index
    %c0_1 = arith.constant 0 : index
    %c0_2 = arith.constant 0 : index
    %0 = vector.load %arg2[%c0, %c0_0, %c0_1, %c0_2] : memref<1x4x8x8xbf16, #tpu.memory_space<vmem>>, vector<1x4x8x8xbf16>
    %1 = vector.shape_cast %0 : vector<1x4x8x8xbf16> to vector<4x8x8xbf16>
    %c0_3 = arith.constant 0 : index
    %c0_4 = arith.constant 0 : index
    %c0_5 = arith.constant 0 : index
    %c0_6 = arith.constant 0 : index
    %2 = vector.load %arg3[%c0_3, %c0_4, %c0_5, %c0_6] : memref<1x4x8x8xbf16, #tpu.memory_space<vmem>>, vector<1x4x8x8xbf16>
    %3 = vector.shape_cast %2 : vector<1x4x8x8xbf16> to vector<4x8x8xbf16>
    %c0_7 = arith.constant 0 : index
    %c0_8 = arith.constant 0 : index
    %c0_9 = arith.constant 0 : index
    %c0_10 = arith.constant 0 : index
    %4 = vector.load %arg4[%c0_7, %c0_8, %c0_9, %c0_10] : memref<1x4x8x8xbf16, #tpu.memory_space<vmem>>, vector<1x4x8x8xbf16>
    %5 = vector.shape_cast %4 : vector<1x4x8x8xbf16> to vector<4x8x8xbf16>
    "tpu.trace_start"() <{level = 10 : i32, message = "hqd,hkd->hqk"}> : () -> ()
    %cst = arith.constant dense<0.000000e+00> : vector<4x8x8xf32>
    %6 = tpu.matmul %1, %3, %cst {dimension_numbers = #tpu.dot_dimension_numbers<[2], [2], [1], [1], [0, 0, 0, 1, 1, 1], [0], [0]>} : vector<4x8x8xbf16>, vector<4x8x8xbf16>, vector<4x8x8xf32> -> vector<4x8x8xf32>
    "tpu.trace_stop"() : () -> ()
    %cst_11 = arith.constant dense<0xFF800000> : vector<4x8xf32>
    %7 = vector.multi_reduction <maximumf>, %6, %cst_11 [2] : vector<4x8x8xf32> to vector<4x8xf32>
    %8 = vector.shape_cast %7 : vector<4x8xf32> to vector<4x8x1xf32>
    %9 = vector.broadcast %8 : vector<4x8x1xf32> to vector<4x8x8xf32>
    %10 = arith.subf %6, %9 : vector<4x8x8xf32>
    %11 = math.exp %10 : vector<4x8x8xf32>
    %cst_12 = arith.constant dense<0.000000e+00> : vector<4x8xf32>
    %12 = vector.multi_reduction <add>, %11, %cst_12 [2] : vector<4x8x8xf32> to vector<4x8xf32>
    %13 = vector.shape_cast %12 : vector<4x8xf32> to vector<4x8x1xf32>
    %14 = tpu.reciprocal %13 {approx = true} : vector<4x8x1xf32> -> vector<4x8x1xf32>
    %15 = vector.broadcast %14 : vector<4x8x1xf32> to vector<4x8x8xf32>
    %16 = arith.mulf %11, %15 : vector<4x8x8xf32>
    %17 = arith.truncf %16 : vector<4x8x8xf32> to vector<4x8x8xbf16>
    "tpu.trace_start"() <{level = 10 : i32, message = "hqk,hkd->hqd"}> : () -> ()
    %cst_13 = arith.constant dense<0.000000e+00> : vector<4x8x8xf32>
    %18 = tpu.matmul %17, %5, %cst_13 {dimension_numbers = #tpu.dot_dimension_numbers<[2], [1], [1], [2], [0, 0, 0, 1, 1, 2], [0], [0]>} : vector<4x8x8xbf16>, vector<4x8x8xbf16>, vector<4x8x8xf32> -> vector<4x8x8xf32>
    "tpu.trace_stop"() : () -> ()
    %19 = vector.extract_strided_slice %18 {offsets = [0, 0, 0], sizes = [1, 8, 8], strides = [1, 1, 1]} : vector<4x8x8xf32> to vector<1x8x8xf32>
    %20 = vector.shape_cast %19 : vector<1x8x8xf32> to vector<8x8xf32>
    %21 = arith.truncf %20 : vector<8x8xf32> to vector<8x8xbf16>
    %c0_14 = arith.constant 0 : index
    %c0_15 = arith.constant 0 : index
    %22 = vector.load %arg8[%c0_14, %c0_15] : memref<8x32xbf16, #tpu.memory_space<vmem>>, vector<8x8xbf16>
    tpu.vector_store %arg8[%c0_14, %c0_15], %21 {strides = array<i32>} : memref<8x32xbf16, #tpu.memory_space<vmem>>, vector<8x8xbf16>,
    %23 = vector.extract_strided_slice %18 {offsets = [1, 0, 0], sizes = [1, 8, 8], strides = [1, 1, 1]} : vector<4x8x8xf32> to vector<1x8x8xf32>
    %24 = vector.shape_cast %23 : vector<1x8x8xf32> to vector<8x8xf32>
    %25 = arith.truncf %24 : vector<8x8xf32> to vector<8x8xbf16>
    %c0_16 = arith.constant 0 : index
    %c8 = arith.constant 8 : index
    %26 = vector.load %arg8[%c0_16, %c8] : memref<8x32xbf16, #tpu.memory_space<vmem>>, vector<8x8xbf16>
    tpu.vector_store %arg8[%c0_16, %c8], %25 {strides = array<i32>} : memref<8x32xbf16, #tpu.memory_space<vmem>>, vector<8x8xbf16>,
    %27 = vector.extract_strided_slice %18 {offsets = [2, 0, 0], sizes = [1, 8, 8], strides = [1, 1, 1]} : vector<4x8x8xf32> to vector<1x8x8xf32>
    %28 = vector.shape_cast %27 : vector<1x8x8xf32> to vector<8x8xf32>
    %29 = arith.truncf %28 : vector<8x8xf32> to vector<8x8xbf16>
    %c0_17 = arith.constant 0 : index
    %c16 = arith.constant 16 : index
    %30 = vector.load %arg8[%c0_17, %c16] : memref<8x32xbf16, #tpu.memory_space<vmem>>, vector<8x8xbf16>
    tpu.vector_store %arg8[%c0_17, %c16], %29 {strides = array<i32>} : memref<8x32xbf16, #tpu.memory_space<vmem>>, vector<8x8xbf16>,
    %31 = vector.extract_strided_slice %18 {offsets = [3, 0, 0], sizes = [1, 8, 8], strides = [1, 1, 1]} : vector<4x8x8xf32> to vector<1x8x8xf32>
    %32 = vector.shape_cast %31 : vector<1x8x8xf32> to vector<8x8xf32>
    %33 = arith.truncf %32 : vector<8x8xf32> to vector<8x8xbf16>
    %c0_18 = arith.constant 0 : index
    %c24 = arith.constant 24 : index
    %34 = vector.load %arg8[%c0_18, %c24] : memref<8x32xbf16, #tpu.memory_space<vmem>>, vector<8x8xbf16>
    tpu.vector_store %arg8[%c0_18, %c24], %33 {strides = array<i32>} : memref<8x32xbf16, #tpu.memory_space<vmem>>, vector<8x8xbf16>,
    %c0_19 = arith.constant 0 : index
    %c0_20 = arith.constant 0 : index
    %35 = vector.load %arg8[%c0_19, %c0_20] : memref<8x32xbf16, #tpu.memory_space<vmem>>, vector<8x32xbf16>
    %c0_21 = arith.constant 0 : index
    %c0_22 = arith.constant 0 : index
    %36 = vector.load %arg5[%c0_21, %c0_22] : memref<32x32xbf16, #tpu.memory_space<vmem>>, vector<32x32xbf16>
    %cst_23 = arith.constant dense<0.000000e+00> : vector<8x32xf32>
    %37 = tpu.matmul %35, %36, %cst_23 {dimension_numbers = #tpu.dot_dimension_numbers<[1], [0], [0], [1], [0, 0, 1, 1], [], []>} : vector<8x32xbf16>, vector<32x32xbf16>, vector<8x32xf32> -> vector<8x32xf32>
    %c0_24 = arith.constant 0 : index
    %c0_25 = arith.constant 0 : index
    %38 = vector.load %arg6[%c0_24, %c0_25] : memref<1x32xf32, #tpu.memory_space<vmem>>, vector<1x32xf32>
    %39 = vector.broadcast %38 : vector<1x32xf32> to vector<8x32xf32>
    %40 = arith.addf %37, %39 : vector<8x32xf32>
    %c0_26 = arith.constant 0 : index
    %c0_27 = arith.constant 0 : index
    %c0_28 = arith.constant 0 : index
    %41 = vector.load %arg7[%c0_26, %c0_27, %c0_28] : memref<1x8x32xf32, #tpu.memory_space<vmem>>, vector<1x8x32xf32>
    %42 = vector.shape_cast %41 : vector<1x8x32xf32> to vector<8x32xf32>
    %43 = vector.shape_cast %40 : vector<8x32xf32> to vector<1x8x32xf32>
    tpu.vector_store %arg7[%c0_26, %c0_27, %c0_28], %43 {strides = array<i32>} : memref<1x8x32xf32, #tpu.memory_space<vmem>>, vector<1x8x32xf32>,
    return
  }
  func.func @transform_0(%arg0: i32, %arg1: i32) -> (i32, i32, i32, i32) {
    %c0_i32 = arith.constant 0 : i32
    %c0_i32_0 = arith.constant 0 : i32
    %c0_i32_1 = arith.constant 0 : i32
    return %arg0, %c0_i32, %arg1, %c0_i32_0 : i32, i32, i32, i32
  }
  func.func @transform_1(%arg0: i32, %arg1: i32) -> (i32, i32, i32, i32) {
    %c0_i32 = arith.constant 0 : i32
    %c0_i32_0 = arith.constant 0 : i32
    %c0_i32_1 = arith.constant 0 : i32
    %c0_i32_2 = arith.constant 0 : i32
    return %arg0, %c0_i32, %c0_i32_0, %c0_i32_1 : i32, i32, i32, i32
  }
  func.func @transform_2(%arg0: i32, %arg1: i32) -> (i32, i32, i32, i32) {
    %c0_i32 = arith.constant 0 : i32
    %c0_i32_0 = arith.constant 0 : i32
    %c0_i32_1 = arith.constant 0 : i32
    %c0_i32_2 = arith.constant 0 : i32
    return %arg0, %c0_i32, %c0_i32_0, %c0_i32_1 : i32, i32, i32, i32
  }
  func.func @transform_3(%arg0: i32, %arg1: i32) -> (i32, i32) {
    %c0_i32 = arith.constant 0 : i32
    %c0_i32_0 = arith.constant 0 : i32
    %c0_i32_1 = arith.constant 0 : i32
    return %c0_i32, %c0_i32_0 : i32, i32
  }
  func.func @transform_4(%arg0: i32, %arg1: i32) -> (i32, i32) {
    %c0_i32 = arith.constant 0 : i32
    %c0_i32_0 = arith.constant 0 : i32
    %c0_i32_1 = arith.constant 0 : i32
    return %c0_i32, %c0_i32_0 : i32, i32
  }
  func.func @transform_5(%arg0: i32, %arg1: i32) -> (i32, i32, i32) {
    %c0_i32 = arith.constant 0 : i32
    %c0_i32_0 = arith.constant 0 : i32
    return %arg0, %arg1, %c0_i32 : i32, i32, i32
  }
}

</mosaic_0001>

<bundles_post_ra>
// kernel: tpu_custom_call.1
= control target key start
LH: loop header
LB: loop body
LE: loop exit
PB: predicated region body
PF: predicated region fallthrough
CT: control target
= control target key end

     0   :  { %s1987_s0 = inlined_call_operand.hbm [shape: bf16[2,4,8,8], index: 0, kind: input, shape index: {}]   ;;  %s1988_s1 = inlined_call_operand.hbm [shape: bf16[2,4,8,8], index: 1, kind: input, shape index: {}]   ;;  %s1989_s2 = inlined_call_operand.hbm [shape: bf16[2,4,8,8], index: 2, kind: input, shape index: {}]   ;;  %s1990_s3 = inlined_call_operand.hbm [shape: bf16[32,32], index: 3, kind: input, shape index: {}]   ;;  %s1991_s4 = inlined_call_operand.hbm [shape: f32[1,32], index: 4, kind: input, shape index: {}]   ;;  %s1992_s5 = inlined_call_operand.hbm [shape: f32[2,8,32], index: 5, kind: output, shape index: {}]  }
   0x1   :  { %2014 = sst [smem:[#allocation22_spill]] %s1988_s1 }
   0x2   :  { %2015 = sst [smem:[#allocation23_spill]] %s1990_s3 }
   0x3   :  { %2016 = sst [smem:[#allocation24_spill]] %s1991_s4 }
   0x4   :  { %10 = vsyncpa [#allocation4], 0 }
   0x5   :  { %12 = vsyncpa [#allocation4 + $0x1], 0 }
   0x6   :  { %13 = vsyncpa [#allocation7], 0 }
   0x7   :  { %15 = vsyncpa [#allocation7 + $0x1], 0 }
   0x8   :  { %16 = vsyncpa [#allocation10], 0 }
   0x9   :  { %17 = vsyncpa [#allocation5], 0 }
   0xa   :  { %19 = vsyncpa [#allocation5 + $0x1], 0  ;;  %s1573_s18 = smov 0   ;;  %s1575_s19 = smov 0  }
   0xb   :  { %s1577_s20 = smov 0   ;;  %s1579_s21 = smov 0  }
   0xc   :  { %s1581_s22 = smov 0   ;;  %s1583_s23 = smov 0  }
   0xd LB: > { %2017 = sst [smem:[#allocation17_spill]] %s1524_s22  ;;  %s1604_s24 = sadd.s32 4294967295, %s1528_s23   ;;  %s1528_s23 = sphi %s1583_s23, %s25_s23   ;;  %s1524_s22 = sphi %s1581_s22, %s2054_s22   ;;  %s1520_s21 = sphi %s1579_s21, %s2053_s21   ;;  %s1516_s20 = sphi %s1577_s20, %s2057_s20   ;;  %s1512_s19 = sphi %s1575_s19, %s2056_s19   ;;  %s1508_s18 = sphi %s1573_s18, %s2055_s18  }
   0xe   : > { %2018 = sst [smem:[#allocation18_spill]] %s1528_s23  ;;  %s1053_s25 = sadd.s32 4294967294, %s1528_s23  }
   0xf   : > { %p53_p0 = scmp.ne.s32.totalorder %s1516_s20, %s1512_s19  ;;  %p54_p1 = scmp.eq.s32.totalorder %s1528_s23, 0 }
  0x10   : > { %p59_p2 = scmp.ne.s32.totalorder %s1512_s19, %s1508_s18  ;;  %p1993_p3 = scmp.eq.s32.totalorder %s1604_s24, 0 }
  0x11   : > { %p1613_p4 = por %p54_p1, %p53_p0  ;;  %p179_p5 = scmp.eq.s32.totalorder %s1604_s24, 1 }
  0x12   : > { %p1620_p6 = por %p1993_p3, %p59_p2  ;;  %p185_p7 = scmp.eq.s32.totalorder %s1053_s25, 1 }
  0x13   : > { %p1624_p8 = por %p179_p5, %p53_p0  ;;  %p1054_p9 = scmp.ge.s32.totalorder %s1528_s23, 1 }
  0x14   : > { %s2020_s27 = scalar_select %p1620_p6, 1, 0 }
  0x15   : > { %s2021_s28 = scalar_select %p1624_p8, 1, 0 }
  0x16   : > { %p1629_p10 = por %p185_p7, %p59_p2  ;;  %p192_p11 = scmp.lt.s32.totalorder %s1528_s23, 3 }
  0x17   : > { %s1530_s6 = smov [#allocation9]   ;;  %s37_s9 = sadd.s32 1, %s1524_s22 }
  0x18   : > { %s2022_s29 = scalar_select %p1629_p10, 1, 0 }
  0x19   : > { %p1634_p12 = pnand %p1054_p9, %p192_p11  ;;  %s204_s7 = sshll.u32 %s1530_s6, 4  ;;  %s1638_s7 = int_to_ptr.vmem [resolvable:$true] %s204_s7 }
  0x1a   : > { %2023 = sst [smem:[#allocation19_spill]] %s2022_s29  ;;  %p1651_p2 = scmp.ge.s32.totalorder %s37_s9, 2 }
  0x1b   : > { %s2024_s30 = scalar_select %p1634_p12, 1, 0 }
  0x1c   : > { %p1190_p13 = pneg %p1634_p12  ;;  %s2027_s3 = sld [smem:[#allocation23_spill]] }
  0x1e   : > { %p1645_p1 = pnand %p1190_p13, %p1993_p3 }
  0x20   : > { %s2025_s8 = scalar_select %p1645_p1, 1, 0 }
  0x21   : > { %p2004_p7 = pneg %p1645_p1 }
  0x22   : > { %s1292_s14 = scalar_lea.hbm %s2027_s3, 256 }
  0x23   : > { %p1293_p5 = scmp.ne.s32.totalorder %s2027_s3, %s1292_s14  ;;  %p1299_p13 = scmp.lt.u32.totalorder %s1292_s14, %s2027_s3 }
  0x25   : > { %p1295_p9 = pnand %p2004_p7, %p1293_p5 }
  0x27   : > { %p1296_p11 = pneg %p1295_p9 }
  0x29   : > { %p1301_p0 = pnand %p1299_p13, %p1296_p11 }
  0x2b   : > { %1304 = shalt.err (!%p1301_p0)
}
  0x2c   : > { %s1305_s6 = scalar_lea.vmem %s1638_s7, 256  ;;  %p1313_p6 = scmp.lt.s32.totalorder %s1638_s7, %s1638_s7 }
  0x2d   : > { %p1306_p3 = scmp.ne.s32.totalorder %s1638_s7, %s1305_s6  ;;  %p1314_p5 = scmp.lt.s32.totalorder %s1305_s6, %s1305_s6 }
  0x2f   : > { %p1308_p10 = pnand %p1306_p3, %p2004_p7  ;;  %p1315_p9 = por %p1314_p5, %p1313_p6 }
  0x31   : > { %p1309_p8 = pneg %p1308_p10 }
  0x33   : > { %p1316_p12 = pnand %p1315_p9, %p1309_p8 }
  0x35   : > { %1319 = shalt.err (!%p1316_p12)
}
  0x36   : > { %s1997_s12 = smov 64   ;;  %s2000_s13 = smov 4  }
  0x37   : > { %1193 = dma.hbm_to_vmem [thread:$0]  (!%p1645_p1), %s2027_s3, 256, %s1638_s7, [#allocation10], %s1997_s12, %s1997_s12, %s2000_s13  }
  0x38   : > { %s2059_s9 = smov (%p1651_p2, %s37_s9), 0  ;;  %p1213_p3 = scmp.lt.s32.totalorder %s1528_s23, 2 }
  0x39   : > { %2028 = sst [smem:[#allocation20_spill]] %s2059_s9  ;;  %s1999_s16 = sand.u32 1, %s1516_s20  }
  0x3a   : > { %s41_s17 = ssub.s32 %s1524_s22, %s2059_s9  ;;  %s1695_s25 = sshll.u32 %s1999_s16, 4 }
  0x3b   : > { %p44_p6 = scmp.eq.s32.totalorder %s41_s17, 0  ;;  %s1698_s6 = sshll.u32 %s1524_s22, 8 }
  0x3c   : > { %p1702_p8 = pnand %p1213_p3, %p1613_p4  ;;  %s251_s7 = sand.u32 1, %s1528_s23  }
  0x3d   : > { %s2030_s11 = sadd.s32 1, %s1516_s20  ;;  %s2032_s1 = sld [smem:[#allocation22_spill]] }
  0x3e   : > { %s2029_s10 = scalar_select %p1702_p8, 1, 0 }
  0x3f   : > { %s1710_s14 = scalar_select %p44_p6, %s1516_s20, %s2030_s11  }
  0x40   : > { %s255_s26 = scalar_lea.vmem [#allocation6], %s1695_s25  ;;  %s1533_s13 = smov [#allocation11]  }
  0x41   : > { %2031 = sst [smem:[#allocation21_spill]] %s1710_s14  ;;  %s262_s17 = sshll.u32 %s255_s26, 4  ;;  %s1719_s17 = int_to_ptr.vmem [resolvable:$true] %s262_s17 }
  0x42   : > { %s1721_s3 = sshll.u32 %s1533_s13, 4  ;;  %s1723_s9 = scalar_lea.sflag [#allocation7], %s251_s7  ;;  %s219_s3 = int_to_ptr.vmem [resolvable:$true] %s1721_s3 }
  0x43   : > { %s1716_s16 = scalar_lea.hbm %s2032_s1, %s1698_s6  ;;  %p1729_p10 = pneg %p1702_p8 }
  0x44   : > { %s1320_s11 = scalar_lea.hbm %s1716_s16, 256  ;;  %s1325_s22 = scalar_lea.hbm %s2032_s1, 512 }
  0x45   : > { %p1321_p4 = scmp.ne.s32.totalorder %s1716_s16, %s1320_s11  ;;  %p1326_p2 = scmp.lt.u32.totalorder %s1716_s16, %s2032_s1 }
  0x46   : > { %s2033_s12 = scalar_select %p1729_p10, 1, 0 }
  0x47   : > { %p1323_p12 = pnand %p1729_p10, %p1321_p4  ;;  %p1327_p11 = scmp.lt.u32.totalorder %s1325_s22, %s1320_s11 }
  0x48   : > { %p1329_p5 = scmp.lt.u32.totalorder %s1320_s11, %s1716_s16 }
  0x49   : > { %p1324_p0 = pneg %p1323_p12  ;;  %p1328_p13 = por %p1327_p11, %p1326_p2 }
  0x4b   : > { %p1330_p9 = por %p1329_p5, %p1328_p13 }
  0x4d   : > { %p1331_p3 = pnand %p1330_p9, %p1324_p0 }
  0x4f   : > { %1334 = shalt.err (!%p1331_p3)
}
  0x50   : > { %s1335_s7 = scalar_lea.vmem %s1719_s17, 256  ;;  %s1534_s15 = smov [#allocation6]  }
  0x51   : > { %p1336_p6 = scmp.ne.s32.totalorder %s1719_s17, %s1335_s7  ;;  %s1340_s26 = sshll.u32 %s1534_s15, 4  ;;  %s1341_s26 = int_to_ptr.vmem [resolvable:$false] %s1340_s26 }
  0x52   : > { %s1342_s14 = scalar_lea.vmem %s1341_s26, 512  ;;  %p1343_p7 = scmp.lt.s32.totalorder %s1719_s17, %s1341_s26 }
  0x53   : > { %p1338_p4 = pnand %p1336_p6, %p1729_p10  ;;  %p1344_p1 = scmp.lt.s32.totalorder %s1342_s14, %s1335_s7 }
  0x55   : > { %p1339_p12 = pneg %p1338_p4  ;;  %p1345_p2 = por %p1344_p1, %p1343_p7 }
  0x57   : > { %p1346_p11 = pnand %p1345_p2, %p1339_p12 }
  0x59   : > { %1349 = shalt.err (!%p1346_p11)
}
  0x5a   : > { %s2034_s22 = smov 4   ;;  %s2035_s11 = smov 64  }
  0x5b   : > { %1203 = dma.hbm_to_vmem [thread:$0]  (!%p1702_p8), %s1716_s16, 256, %s1719_s17, %s1723_s9, %s2035_s11, %s2035_s11, %s2034_s22  }
  0x5c   : > { %s2036_s4 = sld [smem:[#allocation24_spill]]  ;;  %p2037_p7 = scmp.ne.s32.totalorder %s2025_s8, 0 }
  0x5e   : > { %p2038_p0 = pneg %p2037_p7 }
  0x62   : > { %s1350_s26 = scalar_lea.hbm %s2036_s4, 16 }
  0x63   : > { %p1351_p1 = scmp.ne.s32.totalorder %s2036_s4, %s1350_s26  ;;  %p1357_p9 = scmp.lt.u32.totalorder %s1350_s26, %s2036_s4 }
  0x65   : > { %p1353_p13 = pnand %p1351_p1, %p2038_p0 }
  0x67   : > { %p1354_p5 = pneg %p1353_p13 }
  0x69   : > { %p1359_p3 = pnand %p1357_p9, %p1354_p5 }
  0x6b   : > { %1362 = shalt.err (!%p1359_p3)
}
  0x6c   : > { %s1363_s16 = scalar_lea.vmem %s219_s3, 16  ;;  %p2039_p4 = pmov %p2038_p0 }
  0x6d   : > { %p1364_p6 = scmp.ne.s32.totalorder %s219_s3, %s1363_s16  ;;  %s1370_s17 = scalar_lea.vmem %s219_s3, 32 }
  0x6e   : > { %p1371_p11 = scmp.lt.s32.totalorder %s219_s3, %s219_s3  ;;  %p1372_p8 = scmp.lt.s32.totalorder %s1370_s17, %s1363_s16 }
  0x6f   : > { %p1366_p12 = pnand %p1364_p6, %p2039_p4 }
  0x70   : > { %p1373_p10 = por %p1372_p8, %p1371_p11 }
  0x71   : > { %p1367_p2 = pneg %p1366_p12 }
  0x73   : > { %p1374_p0 = pnand %p1373_p10, %p1367_p2 }
  0x75   : > { %1377 = shalt.err (!%p1374_p0)
}
  0x76   : > { %1196 = dma.hbm_to_vmem [thread:$0]  (!%p2037_p7), %s2036_s4, 16, %s219_s3, [#allocation10]  }
  0x77   : > { %s1781_s26 = scalar_lea.hbm %s1987_s0, %s1698_s6  ;;  %s233_s7 = scalar_lea.vmem [#allocation3], %s1695_s25 }
  0x78   : > { %s241_s8 = sshll.u32 %s233_s7, 4  ;;  %s1790_s17 = scalar_lea.hbm %s1989_s2, %s1698_s6  ;;  %s1784_s8 = int_to_ptr.vmem [resolvable:$true] %s241_s8 }
  0x79   : > { %s2040_s13 = sand.u32 1, %s1516_s20   ;;  %s1378_s1 = scalar_lea.hbm %s1781_s26, 256 }
  0x7a   : > { %s1794_s3 = scalar_lea.sflag [#allocation4], %s2040_s13  ;;  %p1379_p8 = scmp.ne.s32.totalorder %s1781_s26, %s1378_s1 }
  0x7b   : > { %p2041_p10 = scmp.ne.s32.totalorder %s2033_s12, 0  ;;  %s1383_s4 = scalar_lea.hbm %s1987_s0, 512 }
  0x7c   : > { %p1384_p13 = scmp.lt.u32.totalorder %s1781_s26, %s1987_s0  ;;  %p1385_p5 = scmp.lt.u32.totalorder %s1383_s4, %s1378_s1 }
  0x7d   : > { %p1381_p1 = pnand %p1379_p8, %p2041_p10  ;;  %p1387_p3 = scmp.lt.u32.totalorder %s1378_s1, %s1781_s26 }
  0x7e   : > { %p1386_p9 = por %p1385_p5, %p1384_p13 }
  0x7f   : > { %p1382_p7 = pneg %p1381_p1 }
  0x80   : > { %p1388_p6 = por %p1387_p3, %p1386_p9 }
  0x82   : > { %p1389_p4 = pnand %p1388_p6, %p1382_p7 }
  0x84   : > { %1392 = shalt.err (!%p1389_p4)
}
  0x85   : > { %s1393_s6 = scalar_lea.vmem %s1784_s8, 256  ;;  %s1535_s14 = smov [#allocation3]  }
  0x86   : > { %p1394_p12 = scmp.ne.s32.totalorder %s1784_s8, %s1393_s6  ;;  %s1398_s16 = sshll.u32 %s1535_s14, 4  ;;  %s1399_s16 = int_to_ptr.vmem [resolvable:$false] %s1398_s16 }
  0x87   : > { %s1400_s29 = scalar_lea.vmem %s1399_s16, 512  ;;  %p1401_p0 = scmp.lt.s32.totalorder %s1784_s8, %s1399_s16 }
  0x88   : > { %p1396_p2 = pnand %p1394_p12, %p2041_p10  ;;  %p1402_p8 = scmp.lt.s32.totalorder %s1400_s29, %s1393_s6 }
  0x8a   : > { %p1397_p11 = pneg %p1396_p2  ;;  %p1403_p1 = por %p1402_p8, %p1401_p0 }
  0x8c   : > { %p1404_p13 = pnand %p1403_p1, %p1397_p11 }
  0x8e   : > { %1407 = shalt.err (!%p1404_p13)
}
  0x8f   : > { %p2042_p7 = scmp.ne.s32.totalorder %s2029_s10, 0  ;;  %s276_s4 = scalar_lea.vmem [#allocation8], %s1695_s25 }
  0x90   : > { %s283_s13 = sshll.u32 %s276_s4, 4  ;;  %s1408_s1 = scalar_lea.hbm %s1790_s17, 256  ;;  %s1822_s13 = int_to_ptr.vmem [resolvable:$true] %s283_s13 }
  0x91   : > { %1200 = dma.hbm_to_vmem [thread:$0]  (!%p2042_p7), %s1781_s26, 256, %s1784_s8, %s1794_s3, %s2035_s11, %s2035_s11, %s2034_s22  }
  0x92   : > { %p1409_p5 = scmp.ne.s32.totalorder %s1790_s17, %s1408_s1  ;;  %s1413_s7 = scalar_lea.hbm %s1989_s2, 512 }
  0x93   : > { %p1414_p6 = scmp.lt.u32.totalorder %s1790_s17, %s1989_s2  ;;  %p1415_p4 = scmp.lt.u32.totalorder %s1413_s7, %s1408_s1 }
  0x94   : > { %p1411_p9 = pnand %p1409_p5, %p2041_p10  ;;  %p1417_p2 = scmp.lt.u32.totalorder %s1408_s1, %s1790_s17 }
  0x95   : > { %p1416_p12 = por %p1415_p4, %p1414_p6 }
  0x96   : > { %p1412_p3 = pneg %p1411_p9 }
  0x97   : > { %p1418_p11 = por %p1417_p2, %p1416_p12 }
  0x99   : > { %p1419_p0 = pnand %p1418_p11, %p1412_p3 }
  0x9b   : > { %1422 = shalt.err (!%p1419_p0)
}
  0x9c   : > { %s1423_s25 = scalar_lea.vmem %s1822_s13, 256  ;;  %s1536_s26 = smov [#allocation8]  }
  0x9d   : > { %p1424_p8 = scmp.ne.s32.totalorder %s1822_s13, %s1423_s25  ;;  %s1428_s8 = sshll.u32 %s1536_s26, 4  ;;  %s1429_s8 = int_to_ptr.vmem [resolvable:$false] %s1428_s8 }
  0x9e   : > { %s1430_s3 = scalar_lea.vmem %s1429_s8, 512  ;;  %p1431_p5 = scmp.lt.s32.totalorder %s1822_s13, %s1429_s8 }
  0x9f   : > { %p1426_p1 = pnand %p1424_p8, %p2041_p10  ;;  %p1432_p9 = scmp.lt.s32.totalorder %s1430_s3, %s1423_s25 }
  0xa1   : > { %p1427_p13 = pneg %p1426_p1  ;;  %p1433_p6 = por %p1432_p9, %p1431_p5 }
  0xa3   : > { %p1434_p4 = pnand %p1433_p6, %p1427_p13 }
  0xa5   : > { %1437 = shalt.err (!%p1434_p4)
}
  0xa6   : > { %1206 = dma.hbm_to_vmem [thread:$0]  (!%p2042_p7), %s1790_s17, 256, %s1822_s13, %s1723_s9, %s2035_s11, %s2035_s11, %s2034_s22  }
  0xa7   : > { %p2043_p10 = scmp.ne.s32.totalorder %s2024_s30, 0 }
  0xa8   : > { %s1852_s12 = sand.u32 (!%p2043_p10), 1, %s1512_s19   ;;  %p2044_p3 = scmp.ne.s32.totalorder (!%p2043_p10), %s2020_s27, 0 }
  0xa9   : > { %295 = sbr.rel (%p2043_p10) target bundleno = 1298 (0x512), region = 40  ;;  %s1068_s16 = sshll.u32 (!%p2043_p10), %s1852_s12, 4 }
  0xaa   : > { %s298_s29 = scalar_lea.sflag (!%p2043_p10), [#allocation4], %s1852_s12  ;;  %s1856_s4 = scalar_lea.vmem (!%p2043_p10), [#allocation3], %s1068_s16 }
  0xb0   : > { %1491 = dma.done.wait (%p2044_p3), %s298_s29, 256  }
  0xb1   : > { %1493 = vsyncadd (%p2044_p3), %s298_s29, 4294967040  ;;  %s306_s9 = sand.u32 1, %s1604_s24   ;;  %s310_s10 = scalar_lea.vmem [#allocation6], %s1068_s16 }
  0xb2   : > { %s307_s30 = scalar_lea.sflag [#allocation7], %s306_s9 }
  0xb3   : > { %1495 = dma.done.wait (%p2044_p3), %s307_s30, 512  }
  0xb4   : > { %1497 = vsyncadd (%p2044_p3), %s307_s30, 4294966784  ;;  %s1867_s22 = scalar_lea.vmem [#allocation8], %s1068_s16  ;;  %p2045_p7 = scmp.eq.s32.totalorder %s1604_s24, 0 }
  0xb6   : > { %1499 = dma.done.wait (%p2045_p7), [#allocation10], 272   ;;  %p2046_p12 = pmov %p2045_p7 }
  0xb7   : > { %v1537_v0 = vmov 0.0   ;;  %vm1538_vm0 = vmmov 0   ;;  %vm377_vm1 = vcmask 64512   ;;  %v369_v1 = vld [vmem:[%s310_s10] sm:$0xf]  ;;  %vm613_vm2 = vcmask 1043456  }
  0xb8   : > { %1501 = vsyncadd (%p2046_p12), [#allocation10], 4294967024  ;;  %1118 = vmatprep.subr.bf16.mxu0 %v1537_v0  ;;  %1124 = vmatprep.subr.bf16.mxu1 %v1537_v0  ;;  %v370_v2 = vld [vmem:[%s310_s10 + $0x4] sm:$0xf]  ;;  %v382_v3 = vsel %vm377_vm1, %v369_v1, 0  ;;  %vm796_vm3 = vcmask 60416  }
  0xb9   : > { %1120 = vmatprep.mubr.msk.bf16.mxu0 %vm1538_vm0, %v1537_v0  ;;  %1126 = vmatprep.mubr.msk.bf16.mxu1 %vm1538_vm0, %v1537_v0  ;;  %v428_v4 = vsel %vm377_vm1, %v370_v2, 0  ;;  %v371_v5 = vld [vmem:[%s310_s10 + $0x8] sm:$0xf]  ;;  %v372_v6 = vld [vmem:[%s310_s10 + $0xc] sm:$0xf]  ;;  %s1539_s24 = smov 8  }
  0xba   : > { %1119 = vmatpush3.bf16.xpose.msra.mxu0 %v382_v3  ;;  %1125 = vmatpush3.bf16.xpose.msra.mxu1 %v428_v4  ;;  %v365_v7 = vld [vmem:[%s1856_s4] sm:$0xf]  ;;  %v366_v8 = vld [vmem:[%s1856_s4 + $0x4] sm:$0xf]  ;;  %v474_v9 = vsel %vm377_vm1, %v371_v5, 0  ;;  %v520_v10 = vsel %vm377_vm1, %v372_v6, 0 }
  0xbb   : > { %1130 = vmatprep.subr.bf16.mxu0 %v1537_v0  ;;  %1136 = vmatprep.subr.bf16.mxu1 %v1537_v0  ;;  %v367_v11 = vld [vmem:[%s1856_s4 + $0x8] sm:$0xf]  ;;  %v368_v12 = vld [vmem:[%s1856_s4 + $0xc] sm:$0xf]  ;;  %v373_v53 = vld [vmem:[%s1867_s22] sm:$0xf] }
  0xbc   : > { %v615_v54 = vsel %vm613_vm2, %v373_v53, 0  ;;  %v374_v55 = vld [vmem:[%s1867_s22 + $0x4] sm:$0xf]  ;;  %v375_v61 = vld [vmem:[%s1867_s22 + $0x8] sm:$0xf]  ;;  %s1540_s27 = smov 16  }
  0xbd   : > { %v661_v56 = vsel %vm613_vm2, %v374_v55, 0  ;;  %v707_v2 = vsel %vm613_vm2, %v375_v61, 0  ;;  %v376_v4 = vld [vmem:[%s1867_s22 + $0xc] sm:$0xf]  ;;  %s1541_s11 = smov 24   ;;  %vm805_vm4 = vcmask 126016  }
  0xbe   : > { %vm814_vm5 = vcmask 191616   ;;  %vm823_vm6 = vcmask 257216   ;;  %vm849_vm7 = vcmask 261120   ;;  %s1073_s17 = sshll.u32 %s1852_s12, 3  ;;  %s1090_s13 = sshll.u32 %s1520_s21, 7 }
  0xbf   : > { %s363_s1 = scalar_lea.vmem [#allocation12], %s1073_s17  ;;  %s1938_s6 = scalar_lea.hbm %s1992_s5, %s1090_s13 }
  0xc0   : > { %s909_s23 = sshll.u32 %s363_s1, 4  ;;  %s895_s14 = scalar_lea.sflag [#allocation5], %s1852_s12  ;;  %s1940_s23 = int_to_ptr.vmem [resolvable:$true] %s909_s23 }
  0xc1   : > { %1121 = vmatmul.mubr.msk.bf16.vlgmr.msra.gmra.mrb[0].mxu0 %vm377_vm1, %v365_v7  ;;  %1127 = vmatmul.mubr.msk.bf16.vlgmr.msra.gmra.mrb[0].mxu1 %vm377_vm1, %v366_v8  ;;  %v753_v7 = vsel %vm613_vm2, %v376_v4, 0  ;;  %s1438_s21 = scalar_lea.vmem %s1940_s23, 128  ;;  %p2047_p11 = scmp.ne.s32.totalorder %s2021_s28, 0 }
  0xc2   : > { %1131 = vmatpush3.bf16.xpose.msra.mxu0 %v474_v9  ;;  %1137 = vmatpush3.bf16.xpose.msra.mxu1 %v520_v10  ;;  %p1439_p2 = scmp.ne.s32.totalorder %s1940_s23, %s1438_s21  ;;  %s1542_s25 = smov [#allocation12]  }
  0xc3   : > { %1132 = vmatprep.mubr.msk.bf16.mxu0 %vm1538_vm0, %v1537_v0  ;;  %1138 = vmatprep.mubr.msk.bf16.mxu1 %vm1538_vm0, %v1537_v0  ;;  %s1442_s26 = sshll.u32 %s1542_s25, 4  ;;  %s1443_s26 = int_to_ptr.vmem [resolvable:$false] %s1442_s26 }
  0xc4   : > { %1142 = vmatprep.subr.bf16.mxu0 %v1537_v0  ;;  %1148 = vmatprep.subr.bf16.mxu1 %v1537_v0  ;;  %p1440_p0 = pnand %p1439_p2, %p2047_p11  ;;  %s1444_s8 = scalar_lea.vmem %s1443_s26, 256 }
  0xc5   : > { %p1445_p1 = scmp.lt.s32.totalorder %s1940_s23, %s1443_s26  ;;  %p1446_p13 = scmp.lt.s32.totalorder %s1444_s8, %s1438_s21 }
  0xc6   : > { %p1441_p8 = pneg %p1440_p0 }
  0xc7   : > { %p1447_p5 = por %p1446_p13, %p1445_p1 }
  0xc9   : > { %1133 = vmatmul.mubr.msk.bf16.vlgmr.msra.gmra.mrb[4].mxu0 %vm377_vm1, %v367_v11  ;;  %1139 = vmatmul.mubr.msk.bf16.vlgmr.msra.gmra.mrb[4].mxu1 %vm377_vm1, %v368_v12  ;;  %p1448_p9 = pnand %p1447_p5, %p1441_p8 }
  0xca   : > { %1144 = vmatprep.mubr.msk.bf16.mxu0 %vm1538_vm0, %v1537_v0  ;;  %1150 = vmatprep.mubr.msk.bf16.mxu1 %vm1538_vm0, %v1537_v0 }
  0xcb   : > { %1143 = vmatpush3.bf16.msra.mxu0 %v615_v54  ;;  %1149 = vmatpush3.bf16.msra.mxu1 %v661_v56 }
  0xcc   : > { %1154 = vmatprep.subr.bf16.mxu0 %v1537_v0  ;;  %1160 = vmatprep.subr.bf16.mxu1 %v1537_v0 }
 0x194   : > { %v418_v13 = vpop.f32.mrb[0].mxu0  ;;  %v464_v14 = vpop.f32.mrb[0].mxu1 }
 0x195   : > { %v1122_v15 = vpop.f32.mrb[1].mxu0  ;;  %v562_v16 = vsel %vm377_vm1, %v418_v13, -inf  ;;  %v1128_v17 = vpop.f32.mrb[1].mxu1  ;;  %v565_v22 = vsel %vm377_vm1, %v464_v14, -inf }
 0x196   : > { %563 = vmax.xlane.f32.xlu0 %v562_v16  ;;  %v421_v18 = vpop.f32.mrb[2].mxu0  ;;  %v467_v19 = vpop.f32.mrb[2].mxu1  ;;  %v1274_v17 = vld [vmem:[#allocation9] sm:$0xff]  }
 0x197   : > { %v1123_v20 = vpop.f32.mrb[3].mxu0  ;;  %v1129_v21 = vpop.f32.mrb[3].mxu1 }
 0x198   : > { %v1275_v20 = vld [vmem:[#allocation9 + $0x8] sm:$0xff]  }
 0x19a   : > { %566 = vmax.xlane.f32.xlu0 %v565_v22 }
 0x19c   : > { %v510_v23 = vpop.f32.mrb[4].mxu0  ;;  %v556_v24 = vpop.f32.mrb[4].mxu1 }
 0x19d   : > { %v1134_v25 = vpop.f32.mrb[5].mxu0  ;;  %v568_v26 = vsel %vm377_vm1, %v510_v23, -inf  ;;  %v1140_v27 = vpop.f32.mrb[5].mxu1  ;;  %v571_v32 = vsel %vm377_vm1, %v556_v24, -inf }
 0x19e   : > { %569 = vmax.xlane.f32.xlu1 %v568_v26  ;;  %v513_v28 = vpop.f32.mrb[6].mxu0  ;;  %v559_v29 = vpop.f32.mrb[6].mxu1 }
 0x19f   : > { %v1135_v30 = vpop.f32.mrb[7].mxu0  ;;  %v1141_v31 = vpop.f32.mrb[7].mxu1 }
 0x1a2   : > { %572 = vmax.xlane.f32.xlu1 %v571_v32 }
 0x223   : > { %v564_v33 = vpop.xlane.xlu0 %563 }
 0x224   : > { %v574_v34 = vsub.f32 %v418_v13, %v564_v33 }
 0x226   : > { %v578_v35 = vmul.f32 1.442695, %v574_v34 }
 0x227   : > { %v567_v36 = vpop.xlane.xlu0 %566 }
 0x228   : > { %1276 = vpow2.f32 %v578_v35  ;;  %v575_v37 = vsub.f32 %v464_v14, %v567_v36 }
 0x22a   : > { %v580_v38 = vmul.f32 1.442695, %v575_v37 }
 0x22b   : > { %v570_v39 = vpop.xlane.xlu1 %569 }
 0x22c   : > { %1278 = vpow2.f32 %v580_v38  ;;  %v576_v40 = vsub.f32 %v510_v23, %v570_v39  ;;  %v1085_v39 = vld [vmem:[#allocation11] ss:$0 sm:$0xff] }
 0x22e   : > { %v582_v41 = vmul.f32 1.442695, %v576_v40 }
 0x22f   : > { %v573_v42 = vpop.xlane.xlu1 %572 }
 0x230   : > { %1280 = vpow2.f32 %v582_v41  ;;  %v577_v43 = vsub.f32 %v556_v24, %v573_v42 }
 0x232   : > { %v1277_v44 = vpop.eup %1276  ;;  %v584_v45 = vmul.f32 1.442695, %v577_v43 }
 0x233   : > { %v586_v46 = vsel %vm377_vm1, %v1277_v44, 0.0 }
 0x234   : > { %1282 = vpow2.f32 %v584_v45  ;;  %587 = vadd.xlane.f32.xlu0 %v586_v46 }
 0x236   : > { %v1279_v47 = vpop.eup %1278 }
 0x237   : > { %v589_v48 = vsel %vm377_vm1, %v1279_v47, 0.0 }
 0x238   : > { %590 = vadd.xlane.f32.xlu1 %v589_v48 }
 0x23a   : > { %v1281_v49 = vpop.eup %1280 }
 0x23b   : > { %v592_v50 = vsel %vm377_vm1, %v1281_v49, 0.0 }
 0x23c   : > { %593 = vadd.xlane.f32.xlu0 %v592_v50 }
 0x23e   : > { %v1283_v51 = vpop.eup %1282 }
 0x23f   : > { %v595_v52 = vsel %vm377_vm1, %v1283_v51, 0.0 }
 0x240   : > { %596 = vadd.xlane.f32.xlu1 %v595_v52 }
 0x2c1   : > { %v588_v57 = vpop.xlane.xlu0 %587 }
 0x2c2   : > { %1284 = vrcp.f32 %v588_v57 }
 0x2c5   : > { %v591_v58 = vpop.xlane.xlu1 %590 }
 0x2c6   : > { %1286 = vrcp.f32 %v591_v58 }
 0x2c9   : > { %v594_v59 = vpop.xlane.xlu0 %593 }
 0x2ca   : > { %1288 = vrcp.f32 %v594_v59 }
 0x2cc   : > { %v1285_v60 = vpop.eup %1284 }
 0x2cd   : > { %v602_v62 = vmul.f32 %v1285_v60, %v1277_v44  ;;  %v597_v63 = vpop.xlane.xlu1 %596 }
 0x2ce   : > { %1290 = vrcp.f32 %v597_v63 }
 0x2cf   : > { %v606_v1 = vpack.c.bf16 %v602_v62, %v602_v62 }
 0x2d0   : > { %v1287_v3 = vpop.eup %1286 }
 0x2d1   : > { %v603_v5 = vmul.f32 %v1287_v3, %v1279_v47  ;;  %1145 = vmatmul.mubr.msk.bf16.vlgmr.msra.gmra.mrb[8].mxu0 %vm377_vm1, %v606_v1 }
 0x2d2   : > { %1155 = vmatpush3.bf16.msra.mxu0 %v707_v2  ;;  %1156 = vmatprep.mubr.msk.bf16.mxu0 %vm1538_vm0, %v1537_v0 }
 0x2d3   : > { %v607_v6 = vpack.c.bf16 %v603_v5, %v603_v5  ;;  %1166 = vmatprep.subr.bf16.mxu0 %v1537_v0 }
 0x2d4   : > { %v1289_v8 = vpop.eup %1288 }
 0x2d5   : > { %v604_v9 = vmul.f32 %v1289_v8, %v1281_v49  ;;  %1151 = vmatmul.mubr.msk.bf16.vlgmr.msra.gmra.mrb[8].mxu1 %vm377_vm1, %v607_v6 }
 0x2d6   : > { %1161 = vmatpush3.bf16.msra.mxu1 %v753_v7  ;;  %1162 = vmatprep.mubr.msk.bf16.mxu1 %vm1538_vm0, %v1537_v0 }
 0x2d7   : > { %v608_v10 = vpack.c.bf16 %v604_v9, %v604_v9 }
 0x2d8   : > { %v1291_v11 = vpop.eup %1290 }
 0x2d9   : > { %v605_v12 = vmul.f32 %v1291_v11, %v1283_v51  ;;  %1157 = vmatmul.mubr.msk.bf16.vlgmr.msra.gmra.mrb[12].mxu0 %vm377_vm1, %v608_v10 }
 0x2da   : > { %1170 = vmatprep.mubr.msk.bf16.mxu0 %vm1538_vm0, %v1537_v0  ;;  %1167 = vmatpush3.bf16.msra.mxu0 %v1274_v17 }
 0x2db   : > { %v609_v13 = vpack.c.bf16 %v605_v12, %v605_v12  ;;  %1168 = vmatprep.subr.bf16.mxu0 %v1537_v0 }
 0x2dd   : > { %1163 = vmatmul.mubr.msk.bf16.vlgmr.msra.gmra.mrb[12].mxu1 %vm377_vm1, %v609_v13 }
 0x2de   : > { %1169 = vmatpush3.bf16.msra.mxu0 %v1275_v20 }
 0x3a4   : > { %v651_v14 = vpop.f32.mrb[8].mxu0 }
 0x3a5   : > { %v795_v15 = vpack.c.bf16 %v651_v14, %v651_v14  ;;  %v1146_v16 = vpop.f32.mrb[9].mxu0 }
 0x3a6   : > { %v654_v18 = vpop.f32.mrb[10].mxu0 }
 0x3a7   : > { %797 = vst.msk [vmem:[#allocation2] sm:$0xf] %vm796_vm3, %v795_v15  ;;  %v1147_v19 = vpop.f32.mrb[11].mxu0 }
 0x3a8   : > { %v697_v21 = vpop.f32.mrb[8].mxu1 }
 0x3a9   : > { %v1096_v22 = vpack.c.bf16 %v697_v21, %v697_v21  ;;  %v1152_v23 = vpop.f32.mrb[9].mxu1 }
 0x3aa   : > { %v700_v24 = vpop.f32.mrb[10].mxu1 }
 0x3ab   : > { %802 = vrot.lane.b32.xlu0 %v1096_v22, %s1539_s24  ;;  %v1153_v25 = vpop.f32.mrb[11].mxu1 }
 0x3ac   : > { %v743_v26 = vpop.f32.mrb[12].mxu0 }
 0x3ad   : > { %v1097_v27 = vpack.c.bf16 %v743_v26, %v743_v26  ;;  %v1158_v28 = vpop.f32.mrb[13].mxu0 }
 0x3ae   : > { %v746_v29 = vpop.f32.mrb[14].mxu0 }
 0x3af   : > { %811 = vrot.lane.b32.xlu1 %v1097_v27, %s1540_s27  ;;  %v1159_v30 = vpop.f32.mrb[15].mxu0 }
 0x3b0   : > { %v789_v31 = vpop.f32.mrb[12].mxu1 }
 0x3b1   : > { %v1098_v32 = vpack.c.bf16 %v789_v31, %v789_v31  ;;  %v1164_v33 = vpop.f32.mrb[13].mxu1 }
 0x3b2   : > { %v792_v34 = vpop.f32.mrb[14].mxu1 }
 0x3b3   : > { %v1165_v0 = vpop.f32.mrb[15].mxu1  ;;  %820 = vrot.lane.b32.xlu1 %v1098_v32, %s1541_s11 }
 0x41d   : > { %v803_v35 = vpop.permute.xlu0 %802 }
 0x41e   : > { %806 = vst.msk [vmem:[#allocation2] sm:$0xf] %vm805_vm4, %v803_v35 }
 0x421   : > { %v812_v36 = vpop.permute.xlu1 %811 }
 0x422   : > { %815 = vst.msk [vmem:[#allocation2] sm:$0xf] %vm814_vm5, %v812_v36 }
 0x425   : > { %v821_v37 = vpop.permute.xlu1 %820 }
 0x426   : > { %824 = vst.msk [vmem:[#allocation2] sm:$0xf] %vm823_vm6, %v821_v37 }
 0x42d   : > { %v825_v38 = vld [vmem:[#allocation2] sm:$0xf] }
 0x42e   : > { %1171 = vmatmul.mubr.msk.bf16.vlgmr.msra.gmra.mrb[16].mxu0 %vm849_vm7, %v825_v38 }
 0x501   : > { %v887_v40 = vpop.f32.mrb[16].mxu0 }
 0x502   : > { %v888_v41 = vadd.f32 %v1085_v39, %v887_v40  ;;  %v1172_v42 = vpop.f32.mrb[17].mxu0 }
 0x503   : > { %v890_v43 = vpop.f32.mrb[18].mxu0 }
 0x504   : > { %v1173_v44 = vpop.f32.mrb[19].mxu0  ;;  %893 = vst.msk [vmem:[%s363_s1] sm:$0xff] %vm849_vm7, %v888_v41 }
 0x505   : > { %1451 = shalt.err (!%p1448_p9)
}
 0x506   : > { %s1452_s3 = scalar_lea.hbm %s1938_s6, 128  ;;  %s1456_s29 = scalar_lea.hbm %s1992_s5, 256 }
 0x507   : > { %p1453_p6 = scmp.ne.s32.totalorder %s1938_s6, %s1452_s3  ;;  %p1457_p3 = scmp.lt.u32.totalorder %s1938_s6, %s1992_s5 }
 0x508   : > { %p1458_p7 = scmp.lt.u32.totalorder %s1456_s29, %s1452_s3  ;;  %p1460_p2 = scmp.lt.u32.totalorder %s1452_s3, %s1938_s6 }
 0x509   : > { %p1454_p4 = pnand %p1453_p6, %p2047_p11 }
 0x50a   : > { %p1459_p12 = por %p1458_p7, %p1457_p3 }
 0x50b   : > { %p1455_p10 = pneg %p1454_p4 }
 0x50c   : > { %p1461_p0 = por %p1460_p2, %p1459_p12 }
 0x50e   : > { %p1462_p8 = pnand %p1461_p0, %p1455_p10 }
 0x510   : > { %1465 = shalt.err (!%p1462_p8)
}
 0x511   : > { %1188 = dma.vmem_to_hbm [thread:$0]  (%p2047_p11), %s1940_s23, 128, %s1938_s6, %s895_s14  }
 0x512 PF: > { %s2048_s30 = sld [smem:[#allocation19_spill]]  ;;  %s2049_s10 = sld [smem:[#allocation18_spill]] }
 0x513   : > { %s921_s22 = sand.u32 1, %s1508_s18  }
 0x514   : > { %s922_s24 = scalar_lea.sflag [#allocation5], %s921_s22 }
 0x518   : > { %p2050_p1 = scmp.ne.s32.totalorder %s2048_s30, 0  ;;  %p2051_p13 = scmp.ge.s32.totalorder %s2049_s10, 2 }
 0x51a   : > { %p1208_p5 = pnand %p2051_p13, %p2050_p1 }
 0x51c   : > { %1503 = dma.done.wait (!%p1208_p5), %s922_s24, 128  }
 0x51d   : > { %1505 = vsyncadd (!%p1208_p5), %s922_s24, 4294967168  ;;  %s25_s23 = sadd.s32 1, %s2049_s10   ;;  %s2052_s28 = sld [smem:[#allocation21_spill]] }
 0x51e   : > { %p22_p9 = scmp.ge.s32.totalorder %s25_s23, 4   ;;  %s2053_s21 = sld [smem:[#allocation17_spill]] }
 0x51f   : > { %s2054_s22 = sld [smem:[#allocation20_spill]]  ;;  %s2055_s18 = smov %s1512_s19 }
 0x520   : > { %s2056_s19 = smov %s1516_s20  ;;  %24 = sbr.rel (!%p22_p9) target bundleno = 13 (0xd), region = 117 }
 0x523   : > { %s2057_s20 = smov %s2052_s28 }
 0x527   :  { %927 = vsyncpa [#allocation4], 1 }
 0x528   :  { %929 = vsyncpa [#allocation4 + $0x1], 1 }
 0x529   :  { %930 = vsyncpa [#allocation7], 1 }
 0x52a   :  { %932 = vsyncpa [#allocation7 + $0x1], 1 }
 0x52b   :  { %933 = vsyncpa [#allocation10], 1 }
 0x52c   :  { %934 = vsyncpa [#allocation5], 1 }
 0x52d   :  { %936 = vsyncpa [#allocation5 + $0x1], 1 }

</bundles_post_ra>
